<compile_context>
chip_gen: v5e
topology: v5e:2x2
jax: 0.10.0
libtpu: 0.0.40
codegen_flags: <defaults>
</compile_context>

<pallas_src>
import jax
import jax.numpy as jnp
from jax.experimental import pallas as pl
from jax.experimental.pallas import tpu as pltpu


def _linear_kernel(x_ref, w_ref, b_ref, o_ref):
    # x_ref: (TB, D_in), w_ref: (D_in, D_out), b_ref: (1, D_out), o_ref: (TB, D_out)
    acc = jnp.dot(x_ref[...], w_ref[...], preferred_element_type=jnp.float32)
    o_ref[...] = (acc + b_ref[...]).astype(o_ref.dtype)


def _round_up(n, m):
    return -(-n // m) * m


def single_gaussian_decoder_forward(x, weight, bias, *, block_b=4096):
    """x: (B, D_in); weight: (D_out, D_in) [PyTorch layout]; bias: (D_out,)."""
    B, D_in = x.shape
    D_out = weight.shape[0]

    # One-time tiny transpose to (D_in, D_out): MXU consumes native K-major
    # layout, no per-grid-step relayout of the resident weight inside the kernel.
    w_t = weight.T
    b2 = bias.reshape(1, D_out)  # 2-D for TPU vreg layout

    # Batch tile: multiple of 8 sublanes, capped at block_b. No jnp.pad of x —
    # the grid is ragged and the final partial block's OOB writes are masked.
    TB = min(_round_up(block_b, 8), _round_up(B, 8))
    n_tiles = pl.cdiv(B, TB)
    if n_tiles == 1 and B > 8:
        # Prefer >=2 tiles so v7x's two TensorCores both participate.
        TB = min(TB, _round_up(-(-B // 2), 8))
        n_tiles = pl.cdiv(B, TB)

    out = pl.pallas_call(
        _linear_kernel,
        out_shape=jax.ShapeDtypeStruct((B, D_out), x.dtype),
        grid_spec=pl.GridSpec(
            grid=(n_tiles,),
            in_specs=[
                pl.BlockSpec((TB, D_in), lambda i: (i, 0)),     # x tile marches over batch
                pl.BlockSpec((D_in, D_out), lambda i: (0, 0)),  # weight resident (full array)
                pl.BlockSpec((1, D_out), lambda i: (0, 0)),     # bias resident (full array)
            ],
            out_specs=pl.BlockSpec((TB, D_out), lambda i: (i, 0)),  # un-padded, masked vst
        ),
        compiler_params=pltpu.CompilerParams(
            dimension_semantics=("parallel",),   # splits batch tiles across v7x dual TC
        ),
    )(x, w_t, b2)

    return out


if __name__ == "__main__":
    # Small shapes consistent with the module: features -> (x, y) location.
    batch = 8
    input_dim = 32
    output_dim = 2
    log_std_init = 0.0

    key = jax.random.PRNGKey(0)
    k_x, k_w, k_b, k_x2 = jax.random.split(key, 4)

    # Deterministic parameter init (mimics nn.Linear's uniform(-1/sqrt(fan_in), 1/sqrt(fan_in)))
    bound = 1.0 / (input_dim ** 0.5)
    weight = jax.random.uniform(k_w, (output_dim, input_dim), jnp.float32, -bound, bound)
    bias = jax.random.uniform(k_b, (output_dim,), jnp.float32, -bound, bound)
    log_std = jnp.ones((output_dim,), jnp.float32) * log_std_init  # unused in forward()

    x = jax.random.normal(k_x, (batch, input_dim), jnp.float32)

    out = single_gaussian_decoder_forward(x, weight, bias)
    out = jax.block_until_ready(out)

    ref = x @ weight.T + bias
    assert out.shape == (batch, output_dim)
    assert jnp.allclose(out, ref, atol=1e-5, rtol=1e-5)

    # Second check: exercises the multi-tile + ragged-last-block path
    # (B=20 -> 2 tiles of 16 rows, last block partially masked).
    x2 = jax.random.normal(k_x2, (20, input_dim), jnp.float32)
    out2 = jax.block_until_ready(single_gaussian_decoder_forward(x2, weight, bias))
    ref2 = x2 @ weight.T + bias
    assert out2.shape == (20, output_dim)
    assert jnp.allclose(out2, ref2, atol=1e-5, rtol=1e-5)

    print("KERNEL_OK")
</pallas_src>

<mosaic_0001>
module attributes {stable_mosaic.version = 11 : i64} {
  func.func @_linear_kernel(%arg0: i32, %arg1: memref<8x32xf32, #tpu.memory_space<vmem>>, %arg2: memref<32x2xf32, #tpu.memory_space<vmem>>, %arg3: memref<1x2xf32, #tpu.memory_space<vmem>>, %arg4: memref<8x2xf32, #tpu.memory_space<vmem>>) attributes {dimension_semantics = [#tpu.dimension_semantics<parallel>], iteration_bounds = array<i64: 1>, scalar_prefetch = 0 : i64, scratch_operands = 0 : i64, tpu.core_type = #tpu.core_type<tc>, window_params = [{transform_indices = @transform_0, window_bounds = array<i64: 8, 32>}, {pipeline_mode = #tpu.pipeline_mode<synchronous>, transform_indices = @transform_1, window_bounds = array<i64: 32, 2>}, {pipeline_mode = #tpu.pipeline_mode<synchronous>, transform_indices = @transform_2, window_bounds = array<i64: 1, 2>}, {transform_indices = @transform_3, window_bounds = array<i64: 8, 2>}]} {
    %c0 = arith.constant 0 : index
    %c0_0 = arith.constant 0 : index
    %0 = vector.load %arg1[%c0, %c0_0] : memref<8x32xf32, #tpu.memory_space<vmem>>, vector<8x32xf32>
    %c0_1 = arith.constant 0 : index
    %c0_2 = arith.constant 0 : index
    %1 = vector.load %arg2[%c0_1, %c0_2] : memref<32x2xf32, #tpu.memory_space<vmem>>, vector<32x2xf32>
    %cst = arith.constant dense<0.000000e+00> : vector<8x2xf32>
    %2 = tpu.matmul %0, %1, %cst {dimension_numbers = #tpu.dot_dimension_numbers<[1], [0], [0], [1], [0, 0, 1, 1], [], []>} : vector<8x32xf32>, vector<32x2xf32>, vector<8x2xf32> -> vector<8x2xf32>
    %c0_3 = arith.constant 0 : index
    %c0_4 = arith.constant 0 : index
    %3 = vector.load %arg3[%c0_3, %c0_4] : memref<1x2xf32, #tpu.memory_space<vmem>>, vector<1x2xf32>
    %4 = vector.broadcast %3 : vector<1x2xf32> to vector<8x2xf32>
    %5 = arith.addf %2, %4 : vector<8x2xf32>
    %c0_5 = arith.constant 0 : index
    %c0_6 = arith.constant 0 : index
    %6 = vector.load %arg4[%c0_5, %c0_6] : memref<8x2xf32, #tpu.memory_space<vmem>>, vector<8x2xf32>
    tpu.vector_store %arg4[%c0_5, %c0_6], %5 {strides = array<i32>} : memref<8x2xf32, #tpu.memory_space<vmem>>, vector<8x2xf32>,
    return
  }
  func.func @transform_0(%arg0: i32) -> (i32, i32) {
    %c0_i32 = arith.constant 0 : i32
    %c0_i32_0 = arith.constant 0 : i32
    return %arg0, %c0_i32 : i32, i32
  }
  func.func @transform_1(%arg0: i32) -> (i32, i32) {
    %c0_i32 = arith.constant 0 : i32
    %c0_i32_0 = arith.constant 0 : i32
    %c0_i32_1 = arith.constant 0 : i32
    return %c0_i32, %c0_i32_0 : i32, i32
  }
  func.func @transform_2(%arg0: i32) -> (i32, i32) {
    %c0_i32 = arith.constant 0 : i32
    %c0_i32_0 = arith.constant 0 : i32
    %c0_i32_1 = arith.constant 0 : i32
    return %c0_i32, %c0_i32_0 : i32, i32
  }
  func.func @transform_3(%arg0: i32) -> (i32, i32) {
    %c0_i32 = arith.constant 0 : i32
    %c0_i32_0 = arith.constant 0 : i32
    return %arg0, %c0_i32 : i32, i32
  }
}

</mosaic_0001>

<bundles_post_ra>
// kernel: tpu_custom_call.1
= control target key start
LH: loop header
LB: loop body
LE: loop exit
PB: predicated region body
PF: predicated region fallthrough
CT: control target
= control target key end

     0   :  { %vm23_vm0 = vcmask 261120   ;;  %vm47_vm1 = vcmask 15360   ;;  %s96_s1 = inlined_call_operand.vmem [shape: f32[32,2], index: 1, kind: input, shape index: {}]   ;;  %s97_s2 = inlined_call_operand.vmem [shape: f32[1,2], index: 2, kind: input, shape index: {}]   ;;  %s98_s0 = inlined_call_operand.vmem [shape: f32[8,32], index: 0, kind: input, shape index: {}]   ;;  %s99_s3 = inlined_call_operand.vmem [shape: f32[8,2], index: 3, kind: output, shape index: {}]  }
   0x1   :  { %v18_v0 = vld [vmem:[%s96_s1 + $0x18] sm:$0xff]  ;;  %v17_v1 = vld [vmem:[%s96_s1 + $0x10] sm:$0xff]  ;;  %v16_v2 = vld [vmem:[%s96_s1 + $0x8] sm:$0xff] }
   0x2   :  { %39 = vmatpush.msra.mxu0 %v18_v0  ;;  %v15_v3 = vld [vmem:[%s96_s1] sm:$0xff] }
   0x3   :  { %v14_v4 = vld [vmem:[%s98_s0] sm:$0xff] }
   0x4   :  { %40 = vmatpush.msra.mxu0 %v17_v1  ;;  %v54_v5 = vld [vmem:[%s97_s2] ss:$0 sm:$0xff] }
   0x6   :  { %41 = vmatpush.msra.mxu0 %v16_v2 }
   0x8   :  { %42 = vmatpush.msra.mxu0 %v15_v3 }
   0x9   :  { %53 = vmatmul.msk.f32.vlgmr.msra.gmra.mxu0 %vm23_vm0, %v14_v4 }
  0x86   :  { %v44_v6 = vpop.f32.mrf.mxu0 }
  0x87   :  { %v45_v7 = vadd.f32 %v54_v5, %v44_v6 }
  0x89   :  { %48 = vst.msk [vmem:[%s99_s3] sm:$0xff] %vm47_vm1, %v45_v7 }

</bundles_post_ra>
